<compile_context>
chip_gen: v5e
topology: v5e:2x2
jax: 0.10.0
libtpu: 0.0.40
codegen_flags: <defaults>
</compile_context>

<pallas_src>
import jax
import jax.numpy as jnp
from jax.experimental import pallas as pl
from jax.experimental.pallas import tpu as pltpu


def _round_up(x, m):
    return ((x + m - 1) // m) * m


def _round_down(x, m):
    return (x // m) * m


def _vmem_capacity_bytes():
    # Generation-aware VMEM capacity (v5e/v6e: 128 MiB, v7x: 64 MiB per TC).
    try:
        return int(pltpu.get_tpu_info().vmem_capacity_bytes)
    except Exception:
        return 64 << 20  # conservative (v7x) default


def _linear_kernel(x_ref, w_ref, b_ref, o_ref, acc_ref):
    """One (batch-tile, K-tile) step of logits = x @ W + b (norm folded into W/b).

    x_ref  : (tb, tk)    flattened image tile (native dtype, cast in-kernel)
    w_ref  : (tk, n_pad) folded weight slab (n padded to 128 lanes)
    b_ref  : (1, n_pad)  folded bias (f32)
    o_ref  : (tb, n_pad) logits tile (f32), written on the last K step
    acc_ref: (tb, n_pad) f32 accumulator scratch
    """
    k = pl.program_id(1)

    @pl.when(k == 0)
    def _():
        acc_ref[...] = jnp.zeros_like(acc_ref)

    x = x_ref[...].astype(w_ref.dtype)       # MXU-native dtype (bf16 by default)
    acc_ref[...] += jnp.dot(x, w_ref[...], preferred_element_type=jnp.float32)

    @pl.when(k == pl.num_programs(1) - 1)
    def _():
        o_ref[...] = acc_ref[...] + b_ref[...]


def _classify(x_flat, w, b, tb, tk, vmem_limit):
    """x_flat: (B, K); w: (K, n_pad); b: (1, n_pad) -> logits (B, n_pad) f32."""
    B, K = x_flat.shape
    n_pad = w.shape[1]
    nb = pl.cdiv(B, tb)
    nk = pl.cdiv(K, tk)
    grid = (nb, nk)

    x_item = jnp.dtype(x_flat.dtype).itemsize
    w_item = jnp.dtype(w.dtype).itemsize
    w_bytes = K * n_pad * w_item
    cost = pl.CostEstimate(
        flops=2 * B * K * n_pad,
        transcendentals=0,
        bytes_accessed=(B * K * x_item
                        + w_bytes * (nb if nk > 1 else 1)
                        + n_pad * 4
                        + B * n_pad * 4),
    )

    def call(use_pipeline_mode):
        resident_kw = {}
        if use_pipeline_mode:
            # Constant-index blocks are never re-fetched -> single buffer.
            resident_kw = dict(pipeline_mode=pl.Buffered(1))
        b_spec = pl.BlockSpec((1, n_pad), lambda i, k: (0, 0), **resident_kw)
        if nk == 1:
            w_spec = pl.BlockSpec((tk, n_pad), lambda i, k: (k, 0), **resident_kw)
        else:
            # W slab changes along the K axis -> keep default double buffering.
            w_spec = pl.BlockSpec((tk, n_pad), lambda i, k: (k, 0))
        return pl.pallas_call(
            _linear_kernel,
            out_shape=jax.ShapeDtypeStruct((B, n_pad), jnp.float32),
            grid=grid,
            in_specs=[
                pl.BlockSpec((tb, tk), lambda i, k: (i, k)),   # streamed x tile
                w_spec,
                b_spec,
            ],
            out_specs=pl.BlockSpec((tb, n_pad), lambda i, k: (i, 0)),
            scratch_shapes=[pltpu.VMEM((tb, n_pad), jnp.float32)],
            compiler_params=pltpu.CompilerParams(
                dimension_semantics=("parallel", "arbitrary"),
                vmem_limit_bytes=int(vmem_limit),
            ),
            cost_estimate=cost,
        )(x_flat, w, b)

    try:
        return call(True)
    except Exception:
        # TODO(synk): pipeline_mode=pl.Buffered(1) unsupported on this jax
        # version; fall back to default (double-buffered) resident blocks.
        return call(False)


class GeneralPallasModel:
    """JAX/Pallas port of GeneralTorchModel (forward path)."""

    def __init__(self, n_class=10, im_mean=None, im_std=None,
                 in_channels=4, im_size=16, defense_method=None,
                 weight_dtype=jnp.bfloat16):
        self.n_class = n_class
        self.num_queries = 0
        self.defense_method = defense_method
        self.guass_sigma = 2
        self.C = in_channels
        self.H = self.W = im_size
        self.K = in_channels * im_size * im_size
        self.n_pad = _round_up(n_class, 128)
        self.weight_dtype = jnp.dtype(weight_dtype)

        # deterministic synthetic classifier weights (the wrapped `model`)
        kw, kb = jax.random.split(jax.random.PRNGKey(0))
        self.w_raw = (jax.random.normal(kw, (self.K, n_class), jnp.float32)
                      * (1.0 / jnp.sqrt(self.K)))
        self.b_raw = jax.random.normal(kb, (1, n_class), jnp.float32) * 0.01

        if im_mean is None:
            im_mean = [0.0] * in_channels
        if im_std is None:
            im_std = [1.0] * in_channels
        self.im_mean = jnp.asarray(im_mean, jnp.float32)   # (C,)
        self.im_std = jnp.asarray(im_std, jnp.float32)     # (C,)

        # Fold normalization into weights once (f32 math, HIGHEST precision):
        hw = self.H * self.W
        inv_std_row = jnp.repeat(1.0 / self.im_std, hw)     # (K,)
        mean_row = jnp.repeat(self.im_mean, hw)              # (K,)
        w_fold = self.w_raw * inv_std_row[:, None]
        bias_shift = jnp.dot(mean_row * inv_std_row, self.w_raw,
                             precision=jax.lax.Precision.HIGHEST)
        b_fold = self.b_raw - bias_shift[None, :]

        # Pad N to 128 lanes for dense (unmasked) output stores.
        pad_n = self.n_pad - n_class
        self.w_fold = jnp.pad(w_fold, ((0, 0), (0, pad_n))).astype(self.weight_dtype)
        self.b_fold = jnp.pad(b_fold, ((0, 0), (0, pad_n)))   # stays f32

        # Generation-aware tiling budget (fixed per model instance).
        self.vmem_cap = _vmem_capacity_bytes()
        self.vmem_budget = max(16 << 20, int(self.vmem_cap * 0.70))
        self.tk = self._choose_tk()

    # ---------- tiling / VMEM sizing ----------

    def _choose_tk(self):
        w_item = self.weight_dtype.itemsize
        # Prefer a fully VMEM-resident, single-buffered W.
        if self.K * self.n_pad * w_item <= self.vmem_budget // 2:
            return self.K
        # Otherwise tile K (slab is double-buffered); keep it <= budget/3.
        t = min(_round_down(self.K, 128), 4096)
        while t >= 128:
            if self.K % t == 0 and 2 * t * self.n_pad * w_item <= self.vmem_budget // 3:
                return t
            t -= 128
        # TODO(synk): K has no small-enough 128-multiple divisor; would need
        # wrapper-side K padding.  Fall back to a resident W.
        return self.K

    def _pick_tb(self, B, x_itemsize):
        w_item = self.weight_dtype.itemsize
        nb_x = 2                                    # double-buffered x tiles
        nb_w = 1 if self.tk == self.K else 2
        fixed = nb_w * self.tk * self.n_pad * w_item + self.n_pad * 4
        per_row = nb_x * self.tk * x_itemsize + 3 * self.n_pad * 4  # out x2 + acc
        avail = max(self.vmem_budget - fixed, per_row * 8)
        tb_cap = max(8, _round_down(min(avail // per_row, 1024), 8))
        if B <= 8:
            tb = B                                  # single full block
        elif B <= 2 * tb_cap:
            # >=2 batch blocks so "parallel" can use both v7x TensorCores.
            tb = min(tb_cap, _round_up(pl.cdiv(B, 2), 8))
        else:
            tb = tb_cap
        return tb, nb_x, nb_w

    def _vmem_limit(self, tb, x_itemsize, nb_x, nb_w):
        w_item = self.weight_dtype.itemsize
        need = (nb_x * tb * self.tk * x_itemsize
                + nb_w * self.tk * self.n_pad * w_item
                + self.n_pad * 4
                + 2 * tb * self.n_pad * 4            # double-buffered output
                + tb * self.n_pad * 4)               # accumulator scratch
        # Never clamp below the computed need; just add margin.
        return max(need + (2 << 20), 16 << 20)

    # ---------- forward path ----------

    def _run(self, image):
        image = jnp.asarray(image)
        if not jnp.issubdtype(image.dtype, jnp.floating):
            image = image.astype(jnp.float32)
        if image.ndim != 4:                          # unsqueeze(0)
            image = image[None]
        B = image.shape[0]
        assert image.shape[1] * image.shape[2] * image.shape[3] == self.K
        # Keep native dtype; cast inside the kernel.  No wrapper-side batch
        # padding: grid uses cdiv and Pallas masks the partial last block.
        x_flat = image.reshape(B, self.K)
        x_itemsize = jnp.dtype(x_flat.dtype).itemsize
        tb, nb_x, nb_w = self._pick_tb(B, x_itemsize)
        vmem_limit = self._vmem_limit(tb, x_itemsize, nb_x, nb_w)
        logits = _classify(x_flat, self.w_fold, self.b_fold, tb, self.tk, vmem_limit)
        return logits[:, :self.n_class]

    def forward(self, image):
        if self.defense_method is not None:
            # TODO(synk): 'jepg' (PIL JPEG) / 'gauss' (scipy gaussian_filter)
            # defenses are not representable as Pallas kernels.
            raise NotImplementedError("defense methods not supported")
        return self._run(image)

    __call__ = forward

    def predict_prob(self, image):
        logits = self._run(image)
        self.num_queries += logits.shape[0]
        return logits

    def predict_label(self, image):
        logits = self.predict_prob(image)
        return jnp.argmax(logits, axis=1)

    def deactivate_defense(self):
        self.defense_method = None

    def activate_defense(self, method, sigma=2):
        if method in ['jepg', 'guass']:
            self.defense_method = method
            self.guass_sigma = sigma
        else:
            raise NameError('False defense method')


if __name__ == "__main__":
    B, C, H, W = 2, 4, 16, 16
    n_class = 10

    key = jax.random.PRNGKey(0)
    x = jax.random.uniform(key, (B, C, H, W), jnp.float32)

    im_mean = [0.485, 0.456, 0.406, 0.5]
    im_std = [0.229, 0.224, 0.225, 0.25]

    # f32-weight model: tight check against the unfolded normalize->matmul path.
    model_f32 = GeneralPallasModel(n_class=n_class, im_mean=im_mean, im_std=im_std,
                                   in_channels=C, im_size=H,
                                   weight_dtype=jnp.float32)
    logits_f32 = jax.block_until_ready(model_f32(x))
    assert logits_f32.shape == (B, n_class)

    mean_a = model_f32.im_mean.reshape(1, C, 1, 1)
    std_a = model_f32.im_std.reshape(1, C, 1, 1)
    xn_ref = ((x - mean_a) / std_a).reshape(B, -1)
    logits_ref = jnp.dot(xn_ref, model_f32.w_raw,
                         precision=jax.lax.Precision.HIGHEST) + model_f32.b_raw
    err32 = float(jnp.max(jnp.abs(logits_f32 - logits_ref)))
    assert jnp.allclose(logits_f32, logits_ref, atol=2e-3, rtol=2e-3), err32

    # Default (bf16-weight) model: half the W traffic/residency, f32 accumulation.
    model = GeneralPallasModel(n_class=n_class, im_mean=im_mean, im_std=im_std,
                               in_channels=C, im_size=H)
    logits_bf = jax.block_until_ready(model(x))
    err_bf = float(jnp.max(jnp.abs(logits_bf - logits_ref)))
    assert jnp.allclose(logits_bf, logits_ref, atol=3e-2, rtol=3e-2), err_bf

    # Partial last batch block path (grid = cdiv(B, tb), no wrapper-side pad).
    B2 = 10
    x2 = jax.random.uniform(jax.random.PRNGKey(1), (B2, C, H, W), jnp.float32)
    logits2 = jax.block_until_ready(model(x2))
    assert logits2.shape == (B2, n_class)
    xn2 = ((x2 - mean_a) / std_a).reshape(B2, -1)
    ref2 = jnp.dot(xn2, model.w_raw,
                   precision=jax.lax.Precision.HIGHEST) + model.b_raw
    err2 = float(jnp.max(jnp.abs(logits2 - ref2)))
    assert jnp.allclose(logits2, ref2, atol=3e-2, rtol=3e-2), err2

    # 3-D input (unsqueeze) path + label prediction.
    logits_single = jax.block_until_ready(model(x[0]))
    assert logits_single.shape == (1, n_class)
    labels = jax.block_until_ready(model.predict_label(x))
    assert labels.shape == (B,)

    print("KERNEL_OK")
</pallas_src>

<mosaic_0001>
module attributes {stable_mosaic.version = 11 : i64} {
  func.func @_linear_kernel(%arg0: i32, %arg1: i32, %arg2: memref<2x1024xf32, #tpu.memory_space<vmem>>, %arg3: memref<1024x128xf32, #tpu.memory_space<vmem>>, %arg4: memref<1x128xf32, #tpu.memory_space<vmem>>, %arg5: memref<2x128xf32, #tpu.memory_space<vmem>>, %arg6: memref<2x128xf32, #tpu.memory_space<vmem>>) attributes {dimension_semantics = [#tpu.dimension_semantics<parallel>, #tpu.dimension_semantics<arbitrary>], iteration_bounds = array<i64: 1, 1>, scalar_prefetch = 0 : i64, scratch_operands = 1 : i64, tpu.core_type = #tpu.core_type<tc>, window_params = [{transform_indices = @transform_0, window_bounds = array<i64: 2, 1024>}, {pipeline_mode = #tpu.pipeline_mode<synchronous>, transform_indices = @transform_1, window_bounds = array<i64: 1024, 128>}, {pipeline_mode = #tpu.pipeline_mode<synchronous>, transform_indices = @transform_2, window_bounds = array<i64: 1, 128>}, {transform_indices = @transform_3, window_bounds = array<i64: 2, 128>}]} {
    %c0_i32 = arith.constant 0 : i32
    %0 = arith.cmpi eq, %arg1, %c0_i32 : i32
    %1 = arith.extui %0 : i1 to i32
    %c0_i32_0 = arith.constant 0 : i32
    %2 = arith.cmpi ne, %1, %c0_i32_0 : i32
    scf.if %2 {
      %cst_10 = arith.constant 0.000000e+00 : f32
      %12 = vector.broadcast %cst_10 : f32 to vector<2x128xf32>
      %c0_11 = arith.constant 0 : index
      %c0_12 = arith.constant 0 : index
      %13 = vector.load %arg6[%c0_11, %c0_12] : memref<2x128xf32, #tpu.memory_space<vmem>>, vector<2x128xf32>
      tpu.vector_store %arg6[%c0_11, %c0_12], %12 {strides = array<i32>} : memref<2x128xf32, #tpu.memory_space<vmem>>, vector<2x128xf32>,
    } else {
    }
    %c0 = arith.constant 0 : index
    %c0_1 = arith.constant 0 : index
    %3 = vector.load %arg2[%c0, %c0_1] : memref<2x1024xf32, #tpu.memory_space<vmem>>, vector<2x1024xf32>
    %c0_2 = arith.constant 0 : index
    %c0_3 = arith.constant 0 : index
    %4 = vector.load %arg6[%c0_2, %c0_3] : memref<2x128xf32, #tpu.memory_space<vmem>>, vector<2x128xf32>
    %c0_4 = arith.constant 0 : index
    %c0_5 = arith.constant 0 : index
    %5 = vector.load %arg3[%c0_4, %c0_5] : memref<1024x128xf32, #tpu.memory_space<vmem>>, vector<1024x128xf32>
    %cst = arith.constant dense<0.000000e+00> : vector<2x128xf32>
    %6 = tpu.matmul %3, %5, %cst {dimension_numbers = #tpu.dot_dimension_numbers<[1], [0], [0], [1], [0, 0, 1, 1], [], []>} : vector<2x1024xf32>, vector<1024x128xf32>, vector<2x128xf32> -> vector<2x128xf32>
    %7 = arith.addf %4, %6 : vector<2x128xf32>
    %c0_6 = arith.constant 0 : index
    %c0_7 = arith.constant 0 : index
    %8 = vector.load %arg6[%c0_6, %c0_7] : memref<2x128xf32, #tpu.memory_space<vmem>>, vector<2x128xf32>
    tpu.vector_store %arg6[%c0_6, %c0_7], %7 {strides = array<i32>} : memref<2x128xf32, #tpu.memory_space<vmem>>, vector<2x128xf32>,
    %c0_i32_8 = arith.constant 0 : i32
    %9 = arith.cmpi eq, %arg1, %c0_i32_8 : i32
    %10 = arith.extui %9 : i1 to i32
    %c0_i32_9 = arith.constant 0 : i32
    %11 = arith.cmpi ne, %10, %c0_i32_9 : i32
    scf.if %11 {
      %c0_10 = arith.constant 0 : index
      %c0_11 = arith.constant 0 : index
      %12 = vector.load %arg6[%c0_10, %c0_11] : memref<2x128xf32, #tpu.memory_space<vmem>>, vector<2x128xf32>
      %c0_12 = arith.constant 0 : index
      %c0_13 = arith.constant 0 : index
      %13 = vector.load %arg4[%c0_12, %c0_13] : memref<1x128xf32, #tpu.memory_space<vmem>>, vector<1x128xf32>
      %14 = vector.broadcast %13 : vector<1x128xf32> to vector<2x128xf32>
      %15 = arith.addf %12, %14 : vector<2x128xf32>
      %c0_14 = arith.constant 0 : index
      %c0_15 = arith.constant 0 : index
      %16 = vector.load %arg5[%c0_14, %c0_15] : memref<2x128xf32, #tpu.memory_space<vmem>>, vector<2x128xf32>
      tpu.vector_store %arg5[%c0_14, %c0_15], %15 {strides = array<i32>} : memref<2x128xf32, #tpu.memory_space<vmem>>, vector<2x128xf32>,
    } else {
    }
    return
  }
  func.func @transform_0(%arg0: i32, %arg1: i32) -> (i32, i32) {
    %c0_i32 = arith.constant 0 : i32
    return %arg0, %arg1 : i32, i32
  }
  func.func @transform_1(%arg0: i32, %arg1: i32) -> (i32, i32) {
    %c0_i32 = arith.constant 0 : i32
    %c0_i32_0 = arith.constant 0 : i32
    return %arg1, %c0_i32 : i32, i32
  }
  func.func @transform_2(%arg0: i32, %arg1: i32) -> (i32, i32) {
    %c0_i32 = arith.constant 0 : i32
    %c0_i32_0 = arith.constant 0 : i32
    %c0_i32_1 = arith.constant 0 : i32
    return %c0_i32, %c0_i32_0 : i32, i32
  }
  func.func @transform_3(%arg0: i32, %arg1: i32) -> (i32, i32) {
    %c0_i32 = arith.constant 0 : i32
    %c0_i32_0 = arith.constant 0 : i32
    return %arg0, %c0_i32 : i32, i32
  }
}

module attributes {stable_mosaic.version = 11 : i64} {
  func.func @_linear_kernel(%arg0: i32, %arg1: i32, %arg2: memref<2x1024xf32, #tpu.memory_space<vmem>>, %arg3: memref<1024x128xf32, #tpu.memory_space<vmem>>, %arg4: memref<1x128xf32, #tpu.memory_space<vmem>>, %arg5: memref<2x128xf32, #tpu.memory_space<vmem>>, %arg6: memref<2x128xf32, #tpu.memory_space<vmem>>) attributes {dimension_semantics = [#tpu.dimension_semantics<parallel>, #tpu.dimension_semantics<arbitrary>], iteration_bounds = array<i64: 1, 1>, scalar_prefetch = 0 : i64, scratch_operands = 1 : i64, tpu.core_type = #tpu.core_type<tc>, window_params = [{transform_indices = @transform_0, window_bounds = array<i64: 2, 1024>}, {transform_indices = @transform_1, window_bounds = array<i64: 1024, 128>}, {pipeline_mode = #tpu.pipeline_mode<synchronous>, transform_indices = @transform_2, window_bounds = array<i64: 1, 128>}, {transform_indices = @transform_3, window_bounds = array<i64: 2, 128>}]} {
    %c0_i32 = arith.constant 0 : i32
    %0 = arith.cmpi eq, %arg1, %c0_i32 : i32
    %1 = arith.extui %0 : i1 to i32
    %c0_i32_0 = arith.constant 0 : i32
    %2 = arith.cmpi ne, %1, %c0_i32_0 : i32
    scf.if %2 {
      %cst_10 = arith.constant 0.000000e+00 : f32
      %12 = vector.broadcast %cst_10 : f32 to vector<2x128xf32>
      %c0_11 = arith.constant 0 : index
      %c0_12 = arith.constant 0 : index
      %13 = vector.load %arg6[%c0_11, %c0_12] : memref<2x128xf32, #tpu.memory_space<vmem>>, vector<2x128xf32>
      tpu.vector_store %arg6[%c0_11, %c0_12], %12 {strides = array<i32>} : memref<2x128xf32, #tpu.memory_space<vmem>>, vector<2x128xf32>,
    } else {
    }
    %c0 = arith.constant 0 : index
    %c0_1 = arith.constant 0 : index
    %3 = vector.load %arg2[%c0, %c0_1] : memref<2x1024xf32, #tpu.memory_space<vmem>>, vector<2x1024xf32>
    %c0_2 = arith.constant 0 : index
    %c0_3 = arith.constant 0 : index
    %4 = vector.load %arg6[%c0_2, %c0_3] : memref<2x128xf32, #tpu.memory_space<vmem>>, vector<2x128xf32>
    %c0_4 = arith.constant 0 : index
    %c0_5 = arith.constant 0 : index
    %5 = vector.load %arg3[%c0_4, %c0_5] : memref<1024x128xf32, #tpu.memory_space<vmem>>, vector<1024x128xf32>
    %cst = arith.constant dense<0.000000e+00> : vector<2x128xf32>
    %6 = tpu.matmul %3, %5, %cst {dimension_numbers = #tpu.dot_dimension_numbers<[1], [0], [0], [1], [0, 0, 1, 1], [], []>} : vector<2x1024xf32>, vector<1024x128xf32>, vector<2x128xf32> -> vector<2x128xf32>
    %7 = arith.addf %4, %6 : vector<2x128xf32>
    %c0_6 = arith.constant 0 : index
    %c0_7 = arith.constant 0 : index
    %8 = vector.load %arg6[%c0_6, %c0_7] : memref<2x128xf32, #tpu.memory_space<vmem>>, vector<2x128xf32>
    tpu.vector_store %arg6[%c0_6, %c0_7], %7 {strides = array<i32>} : memref<2x128xf32, #tpu.memory_space<vmem>>, vector<2x128xf32>,
    %c0_i32_8 = arith.constant 0 : i32
    %9 = arith.cmpi eq, %arg1, %c0_i32_8 : i32
    %10 = arith.extui %9 : i1 to i32
    %c0_i32_9 = arith.constant 0 : i32
    %11 = arith.cmpi ne, %10, %c0_i32_9 : i32
    scf.if %11 {
      %c0_10 = arith.constant 0 : index
      %c0_11 = arith.constant 0 : index
      %12 = vector.load %arg6[%c0_10, %c0_11] : memref<2x128xf32, #tpu.memory_space<vmem>>, vector<2x128xf32>
      %c0_12 = arith.constant 0 : index
      %c0_13 = arith.constant 0 : index
      %13 = vector.load %arg4[%c0_12, %c0_13] : memref<1x128xf32, #tpu.memory_space<vmem>>, vector<1x128xf32>
      %14 = vector.broadcast %13 : vector<1x128xf32> to vector<2x128xf32>
      %15 = arith.addf %12, %14 : vector<2x128xf32>
      %c0_14 = arith.constant 0 : index
      %c0_15 = arith.constant 0 : index
      %16 = vector.load %arg5[%c0_14, %c0_15] : memref<2x128xf32, #tpu.memory_space<vmem>>, vector<2x128xf32>
      tpu.vector_store %arg5[%c0_14, %c0_15], %15 {strides = array<i32>} : memref<2x128xf32, #tpu.memory_space<vmem>>, vector<2x128xf32>,
    } else {
    }
    return
  }
  func.func @transform_0(%arg0: i32, %arg1: i32) -> (i32, i32) {
    %c0_i32 = arith.constant 0 : i32
    return %arg0, %arg1 : i32, i32
  }
  func.func @transform_1(%arg0: i32, %arg1: i32) -> (i32, i32) {
    %c0_i32 = arith.constant 0 : i32
    %c0_i32_0 = arith.constant 0 : i32
    return %arg1, %c0_i32 : i32, i32
  }
  func.func @transform_2(%arg0: i32, %arg1: i32) -> (i32, i32) {
    %c0_i32 = arith.constant 0 : i32
    %c0_i32_0 = arith.constant 0 : i32
    %c0_i32_1 = arith.constant 0 : i32
    return %c0_i32, %c0_i32_0 : i32, i32
  }
  func.func @transform_3(%arg0: i32, %arg1: i32) -> (i32, i32) {
    %c0_i32 = arith.constant 0 : i32
    %c0_i32_0 = arith.constant 0 : i32
    return %arg0, %c0_i32 : i32, i32
  }
}

</mosaic_0001>

<bundles_post_ra>
// kernel: tpu_custom_call.1
= control target key start
LH: loop header
LB: loop body
LE: loop exit
PB: predicated region body
PF: predicated region fallthrough
CT: control target
= control target key end

     0   :  { %8 = vsyncpa [#allocation4], 0  ;;  %s515_s0 = inlined_call_operand.hbm [shape: f32[2,1024], index: 0, kind: input, shape index: {}]   ;;  %s516_s1 = inlined_call_operand.hbm [shape: f32[1024,128], index: 1, kind: input, shape index: {}]   ;;  %s517_s2 = inlined_call_operand.vmem [shape: f32[1,128], index: 2, kind: input, shape index: {}]   ;;  %s518_s3 = inlined_call_operand.hbm [shape: f32[2,128], index: 3, kind: output, shape index: {}]  }
   0x1   :  { %9 = vsyncpa [#allocation7], 0 }
   0x2   :  { %10 = vsyncpa [#allocation5], 0  ;;  %s16_s14 = sshll.u32 %s515_s0, 4  ;;  %s477_s15 = smov [#allocation3]   ;;  %s17_s14 = int_to_ptr.hbm [resolvable:$true] %s16_s14 }
   0x3   :  { %s18_s16 = sshll.u32 %s477_s15, 4  ;;  %s26_s19 = sshll.u32 %s516_s1, 4  ;;  %s19_s16 = int_to_ptr.vmem [resolvable:$true] %s18_s16  ;;  %s27_s19 = int_to_ptr.hbm [resolvable:$true] %s26_s19 }
   0x4   :  { %21 = dma.hbm_to_vmem [thread:$0]  %s17_s14, 256, %s19_s16, [#allocation4]  }
   0x5   :  { %s478_s20 = smov [#allocation6]   ;;  %s479_s22 = smov 128  }
   0x6   :  { %s28_s21 = sshll.u32 %s478_s20, 4  ;;  %s480_s23 = smov 8   ;;  %s29_s21 = int_to_ptr.vmem [resolvable:$true] %s28_s21 }
   0x7   :  { %34 = dma.hbm_to_vmem [thread:$0]  %s27_s19, 16384, %s29_s21, [#allocation7], %s479_s22, %s479_s22, %s480_s23  }
   0x8   :  { %471 = dma.done.wait [#allocation4], 256  }
   0x9   :  { %472 = vsyncadd [#allocation4], 4294967040 }
   0xa   :  { %473 = dma.done.wait [#allocation7], 16384  }
   0xb   :  { %474 = vsyncadd [#allocation7], 4294950912  ;;  %v68_v0 = vld [vmem:[#allocation6 + $0x78] sm:$0xff]  ;;  %v67_v2 = vld [vmem:[#allocation6 + $0x70] sm:$0xff]  ;;  %s482_s24 = smov [#allocation8]   ;;  %s381_s28 = sshll.u32 %s518_s3, 4  ;;  %s382_s28 = int_to_ptr.hbm [resolvable:$true] %s381_s28 }
   0xc   :  { %v100_v1 = vld [vmem:[#allocation6 + $0x178] sm:$0xff]  ;;  %202 = vmatpush.msra.mxu0 %v68_v0  ;;  %v99_v4 = vld [vmem:[#allocation6 + $0x170] sm:$0xff]  ;;  %v66_v6 = vld [vmem:[#allocation6 + $0x68] sm:$0xff]  ;;  %s379_s25 = sshll.u32 %s482_s24, 4  ;;  %s380_s25 = int_to_ptr.vmem [resolvable:$true] %s379_s25 }
   0xd   :  { %242 = vmatpush.msra.mxu2 %v100_v1  ;;  %v84_v3 = vld [vmem:[#allocation6 + $0xf8] sm:$0xff]  ;;  %v83_v7 = vld [vmem:[#allocation6 + $0xf0] sm:$0xff]  ;;  %v98_v8 = vld [vmem:[#allocation6 + $0x168] sm:$0xff] }
   0xe   :  { %v116_v5 = vld [vmem:[#allocation6 + $0x1f8] sm:$0xff]  ;;  %222 = vmatpush.msra.mxu1 %v84_v3  ;;  %203 = vmatpush.msra.mxu0 %v67_v2  ;;  %v115_v9 = vld [vmem:[#allocation6 + $0x1f0] sm:$0xff]  ;;  %v82_v10 = vld [vmem:[#allocation6 + $0xe8] sm:$0xff] }
   0xf   :  { %262 = vmatpush.msra.mxu3 %v116_v5  ;;  %243 = vmatpush.msra.mxu2 %v99_v4  ;;  %v65_v11 = vld [vmem:[#allocation6 + $0x60] sm:$0xff]  ;;  %v114_v13 = vld [vmem:[#allocation6 + $0x1e8] sm:$0xff]  ;;  %v64_v16 = vld [vmem:[#allocation6 + $0x58] sm:$0xff] }
  0x10   :  { %223 = vmatpush.msra.mxu1 %v83_v7  ;;  %v97_v12 = vld [vmem:[#allocation6 + $0x160] sm:$0xff]  ;;  %204 = vmatpush.msra.mxu0 %v66_v6  ;;  %v96_v17 = vld [vmem:[#allocation6 + $0x158] sm:$0xff]  ;;  %v63_v20 = vld [vmem:[#allocation6 + $0x50] sm:$0xff] }
  0x11   :  { %263 = vmatpush.msra.mxu3 %v115_v9  ;;  %244 = vmatpush.msra.mxu2 %v98_v8  ;;  %v81_v14 = vld [vmem:[#allocation6 + $0xe0] sm:$0xff]  ;;  %v80_v18 = vld [vmem:[#allocation6 + $0xd8] sm:$0xff]  ;;  %v95_v21 = vld [vmem:[#allocation6 + $0x150] sm:$0xff] }
  0x12   :  { %v113_v15 = vld [vmem:[#allocation6 + $0x1e0] sm:$0xff]  ;;  %224 = vmatpush.msra.mxu1 %v82_v10  ;;  %205 = vmatpush.msra.mxu0 %v65_v11  ;;  %v112_v19 = vld [vmem:[#allocation6 + $0x1d8] sm:$0xff]  ;;  %v79_v22 = vld [vmem:[#allocation6 + $0xd0] sm:$0xff] }
  0x13   :  { %264 = vmatpush.msra.mxu3 %v114_v13  ;;  %245 = vmatpush.msra.mxu2 %v97_v12  ;;  %v111_v23 = vld [vmem:[#allocation6 + $0x1d0] sm:$0xff]  ;;  %v62_v24 = vld [vmem:[#allocation6 + $0x48] sm:$0xff]  ;;  %v61_v28 = vld [vmem:[#allocation6 + $0x40] sm:$0xff] }
  0x14   :  { %225 = vmatpush.msra.mxu1 %v81_v14  ;;  %206 = vmatpush.msra.mxu0 %v64_v16  ;;  %v94_v25 = vld [vmem:[#allocation6 + $0x148] sm:$0xff]  ;;  %v93_v29 = vld [vmem:[#allocation6 + $0x140] sm:$0xff]  ;;  %v60_v32 = vld [vmem:[#allocation6 + $0x38] sm:$0xff] }
  0x15   :  { %265 = vmatpush.msra.mxu3 %v113_v15  ;;  %246 = vmatpush.msra.mxu2 %v96_v17  ;;  %v78_v26 = vld [vmem:[#allocation6 + $0xc8] sm:$0xff]  ;;  %v77_v30 = vld [vmem:[#allocation6 + $0xc0] sm:$0xff]  ;;  %v92_v33 = vld [vmem:[#allocation6 + $0x138] sm:$0xff] }
  0x16   :  { %226 = vmatpush.msra.mxu1 %v80_v18  ;;  %207 = vmatpush.msra.mxu0 %v63_v20  ;;  %v110_v27 = vld [vmem:[#allocation6 + $0x1c8] sm:$0xff]  ;;  %v109_v31 = vld [vmem:[#allocation6 + $0x1c0] sm:$0xff]  ;;  %v76_v34 = vld [vmem:[#allocation6 + $0xb8] sm:$0xff] }
  0x17   :  { %266 = vmatpush.msra.mxu3 %v112_v19  ;;  %247 = vmatpush.msra.mxu2 %v95_v21  ;;  %v108_v35 = vld [vmem:[#allocation6 + $0x1b8] sm:$0xff]  ;;  %v59_v36 = vld [vmem:[#allocation6 + $0x30] sm:$0xff]  ;;  %v58_v40 = vld [vmem:[#allocation6 + $0x28] sm:$0xff] }
  0x18   :  { %227 = vmatpush.msra.mxu1 %v79_v22  ;;  %208 = vmatpush.msra.mxu0 %v62_v24  ;;  %v91_v37 = vld [vmem:[#allocation6 + $0x130] sm:$0xff]  ;;  %v90_v41 = vld [vmem:[#allocation6 + $0x128] sm:$0xff]  ;;  %v57_v44 = vld [vmem:[#allocation6 + $0x20] sm:$0xff] }
  0x19   :  { %267 = vmatpush.msra.mxu3 %v111_v23  ;;  %248 = vmatpush.msra.mxu2 %v94_v25  ;;  %v75_v38 = vld [vmem:[#allocation6 + $0xb0] sm:$0xff]  ;;  %v74_v42 = vld [vmem:[#allocation6 + $0xa8] sm:$0xff]  ;;  %v89_v45 = vld [vmem:[#allocation6 + $0x120] sm:$0xff] }
  0x1a   :  { %228 = vmatpush.msra.mxu1 %v78_v26  ;;  %209 = vmatpush.msra.mxu0 %v61_v28  ;;  %v107_v39 = vld [vmem:[#allocation6 + $0x1b0] sm:$0xff]  ;;  %v106_v43 = vld [vmem:[#allocation6 + $0x1a8] sm:$0xff]  ;;  %v73_v46 = vld [vmem:[#allocation6 + $0xa0] sm:$0xff] }
  0x1b   :  { %268 = vmatpush.msra.mxu3 %v110_v27  ;;  %249 = vmatpush.msra.mxu2 %v93_v29  ;;  %v105_v47 = vld [vmem:[#allocation6 + $0x1a0] sm:$0xff]  ;;  %v56_v48 = vld [vmem:[#allocation6 + $0x18] sm:$0xff]  ;;  %v55_v52 = vld [vmem:[#allocation6 + $0x10] sm:$0xff] }
  0x1c   :  { %229 = vmatpush.msra.mxu1 %v77_v30  ;;  %210 = vmatpush.msra.mxu0 %v60_v32  ;;  %v88_v49 = vld [vmem:[#allocation6 + $0x118] sm:$0xff]  ;;  %v87_v53 = vld [vmem:[#allocation6 + $0x110] sm:$0xff]  ;;  %v54_v56 = vld [vmem:[#allocation6 + $0x8] sm:$0xff] }
  0x1d   :  { %269 = vmatpush.msra.mxu3 %v109_v31  ;;  %250 = vmatpush.msra.mxu2 %v92_v33  ;;  %v72_v50 = vld [vmem:[#allocation6 + $0x98] sm:$0xff]  ;;  %v71_v54 = vld [vmem:[#allocation6 + $0x90] sm:$0xff]  ;;  %v86_v57 = vld [vmem:[#allocation6 + $0x108] sm:$0xff] }
  0x1e   :  { %230 = vmatpush.msra.mxu1 %v76_v34  ;;  %211 = vmatpush.msra.mxu0 %v59_v36  ;;  %v104_v51 = vld [vmem:[#allocation6 + $0x198] sm:$0xff]  ;;  %v103_v55 = vld [vmem:[#allocation6 + $0x190] sm:$0xff]  ;;  %v70_v58 = vld [vmem:[#allocation6 + $0x88] sm:$0xff] }
  0x1f   :  { %270 = vmatpush.msra.mxu3 %v108_v35  ;;  %251 = vmatpush.msra.mxu2 %v91_v37  ;;  %v102_v59 = vld [vmem:[#allocation6 + $0x188] sm:$0xff]  ;;  %v53_v60 = vld [vmem:[#allocation6] sm:$0xff]  ;;  %v132_v62 = vld [vmem:[#allocation6 + $0x278] sm:$0xff] }
  0x20   :  { %231 = vmatpush.msra.mxu1 %v75_v38  ;;  %212 = vmatpush.msra.mxu0 %v58_v40  ;;  %v85_v61 = vld [vmem:[#allocation6 + $0x100] sm:$0xff]  ;;  %v164_v63 = vld [vmem:[#allocation6 + $0x378] sm:$0xff]  ;;  %v131_v2 = vld [vmem:[#allocation6 + $0x270] sm:$0xff] }
  0x21   :  { %271 = vmatpush.msra.mxu3 %v107_v39  ;;  %252 = vmatpush.msra.mxu2 %v90_v41  ;;  %v69_v0 = vld [vmem:[#allocation6 + $0x80] sm:$0xff]  ;;  %v148_v3 = vld [vmem:[#allocation6 + $0x2f8] sm:$0xff]  ;;  %v163_v4 = vld [vmem:[#allocation6 + $0x370] sm:$0xff] }
  0x22   :  { %232 = vmatpush.msra.mxu1 %v74_v42  ;;  %213 = vmatpush.msra.mxu0 %v57_v44  ;;  %v101_v1 = vld [vmem:[#allocation6 + $0x180] sm:$0xff]  ;;  %v180_v5 = vld [vmem:[#allocation6 + $0x3f8] sm:$0xff]  ;;  %v130_v6 = vld [vmem:[#allocation6 + $0x268] sm:$0xff] }
  0x23   :  { %272 = vmatpush.msra.mxu3 %v106_v43  ;;  %253 = vmatpush.msra.mxu2 %v89_v45  ;;  %v147_v7 = vld [vmem:[#allocation6 + $0x2f0] sm:$0xff]  ;;  %v162_v8 = vld [vmem:[#allocation6 + $0x368] sm:$0xff]  ;;  %v129_v10 = vld [vmem:[#allocation6 + $0x260] sm:$0xff] }
  0x24   :  { %233 = vmatpush.msra.mxu1 %v73_v46  ;;  %214 = vmatpush.msra.mxu0 %v56_v48  ;;  %v179_v9 = vld [vmem:[#allocation6 + $0x3f0] sm:$0xff]  ;;  %v146_v11 = vld [vmem:[#allocation6 + $0x2e8] sm:$0xff]  ;;  %v161_v13 = vld [vmem:[#allocation6 + $0x360] sm:$0xff] }
  0x25   :  { %273 = vmatpush.msra.mxu3 %v105_v47  ;;  %254 = vmatpush.msra.mxu2 %v88_v49  ;;  %v50_v12 = vld [vmem:[#allocation3] sm:$0xff]  ;;  %v178_v14 = vld [vmem:[#allocation6 + $0x3e8] sm:$0xff]  ;;  %v128_v15 = vld [vmem:[#allocation6 + $0x258] sm:$0xff] }
  0x26   :  { %234 = vmatpush.msra.mxu1 %v72_v50  ;;  %215 = vmatpush.msra.mxu0 %v55_v52  ;;  %183 = vst [vmem:[#allocation1] ss:$4 sm:$0xff] %v50_v12  ;;  %v145_v16 = vld [vmem:[#allocation6 + $0x2e0] sm:$0xff]  ;;  %v160_v17 = vld [vmem:[#allocation6 + $0x358] sm:$0xff]  ;;  %v127_v19 = vld [vmem:[#allocation6 + $0x250] sm:$0xff] }
  0x27   :  { %274 = vmatpush.msra.mxu3 %v104_v51  ;;  %255 = vmatpush.msra.mxu2 %v87_v53  ;;  %v177_v18 = vld [vmem:[#allocation6 + $0x3e0] sm:$0xff]  ;;  %v144_v20 = vld [vmem:[#allocation6 + $0x2d8] sm:$0xff]  ;;  %v159_v21 = vld [vmem:[#allocation6 + $0x350] sm:$0xff] }
  0x28   :  { %235 = vmatpush.msra.mxu1 %v71_v54  ;;  %216 = vmatpush.msra.mxu0 %v54_v56  ;;  %v176_v22 = vld [vmem:[#allocation6 + $0x3d8] sm:$0xff]  ;;  %v126_v23 = vld [vmem:[#allocation6 + $0x248] sm:$0xff]  ;;  %v143_v24 = vld [vmem:[#allocation6 + $0x2d0] sm:$0xff] }
  0x29   :  { %275 = vmatpush.msra.mxu3 %v103_v55  ;;  %256 = vmatpush.msra.mxu2 %v86_v57  ;;  %v158_v25 = vld [vmem:[#allocation6 + $0x348] sm:$0xff]  ;;  %v175_v26 = vld [vmem:[#allocation6 + $0x3d0] sm:$0xff]  ;;  %v51_v27 = vld [vmem:[#allocation3 + $0x8] sm:$0xff] }
  0x2a   :  { %236 = vmatpush.msra.mxu1 %v70_v58  ;;  %217 = vmatpush.msra.mxu0 %v53_v60  ;;  %v125_v28 = vld [vmem:[#allocation6 + $0x240] sm:$0xff]  ;;  %v142_v29 = vld [vmem:[#allocation6 + $0x2c8] sm:$0xff]  ;;  %v124_v32 = vld [vmem:[#allocation6 + $0x238] sm:$0xff]  ;;  %185 = vst [vmem:[#allocation1 + $0x20] ss:$4 sm:$0xff] %v51_v27 }
  0x2b   :  { %276 = vmatpush.msra.mxu3 %v102_v59  ;;  %257 = vmatpush.msra.mxu2 %v85_v61  ;;  %v157_v30 = vld [vmem:[#allocation6 + $0x340] sm:$0xff]  ;;  %v174_v31 = vld [vmem:[#allocation6 + $0x3c8] sm:$0xff]  ;;  %v156_v34 = vld [vmem:[#allocation6 + $0x338] sm:$0xff] }
  0x2c   :  { %282 = vmatpush.msrb.mxu0 %v132_v62  ;;  %237 = vmatpush.msra.mxu1 %v69_v0  ;;  %v141_v33 = vld [vmem:[#allocation6 + $0x2c0] sm:$0xff]  ;;  %v123_v36 = vld [vmem:[#allocation6 + $0x230] sm:$0xff]  ;;  %v140_v37 = vld [vmem:[#allocation6 + $0x2b8] sm:$0xff] }
  0x2d   :  { %322 = vmatpush.msrb.mxu2 %v164_v63  ;;  %277 = vmatpush.msra.mxu3 %v101_v1  ;;  %v173_v35 = vld [vmem:[#allocation6 + $0x3c0] sm:$0xff]  ;;  %v155_v38 = vld [vmem:[#allocation6 + $0x330] sm:$0xff]  ;;  %v172_v39 = vld [vmem:[#allocation6 + $0x3b8] sm:$0xff] }
  0x2e   :  { %283 = vmatpush.msrb.mxu0 %v131_v2  ;;  %302 = vmatpush.msrb.mxu1 %v148_v3  ;;  %v122_v40 = vld [vmem:[#allocation6 + $0x228] sm:$0xff]  ;;  %v139_v41 = vld [vmem:[#allocation6 + $0x2b0] sm:$0xff]  ;;  %v121_v45 = vld [vmem:[#allocation6 + $0x220] sm:$0xff] }
  0x2f   :  { %323 = vmatpush.msrb.mxu2 %v163_v4  ;;  %342 = vmatpush.msrb.mxu3 %v180_v5  ;;  %v154_v42 = vld [vmem:[#allocation6 + $0x328] sm:$0xff]  ;;  %v171_v43 = vld [vmem:[#allocation6 + $0x3b0] sm:$0xff]  ;;  %v153_v47 = vld [vmem:[#allocation6 + $0x320] sm:$0xff] }
  0x30   :  { %284 = vmatpush.msrb.mxu0 %v130_v6  ;;  %303 = vmatpush.msrb.mxu1 %v147_v7  ;;  %v188_v44 = vld.sshfl [vmem:[#allocation1 + $0x10] sm:$0xff pattern:$0x73625140]  ;;  %v138_v46 = vld [vmem:[#allocation6 + $0x2a8] sm:$0xff]  ;;  %v137_v52 = vld [vmem:[#allocation6 + $0x2a0] sm:$0xff] }
  0x31   :  { %324 = vmatpush.msrb.mxu2 %v162_v8  ;;  %343 = vmatpush.msrb.mxu3 %v179_v9  ;;  %v170_v48 = vld [vmem:[#allocation6 + $0x3a8] sm:$0xff]  ;;  %v189_v50 = vld.sshfl [vmem:[#allocation1 + $0x18] sm:$0xff pattern:$0x73625140]  ;;  %v119_v56 = vld [vmem:[#allocation6 + $0x210] sm:$0xff] }
  0x32   :  { %285 = vmatpush.msrb.mxu0 %v129_v10  ;;  %304 = vmatpush.msrb.mxu1 %v146_v11  ;;  %v186_v49 = vld.sshfl [vmem:[#allocation1] sm:$0xff pattern:$0x73625140]  ;;  %v120_v51 = vld [vmem:[#allocation6 + $0x218] sm:$0xff]  ;;  %v151_v58 = vld [vmem:[#allocation6 + $0x310] sm:$0xff]  ;;  %v481_v10 = vmov 0.0  }
  0x33   :  { %325 = vmatpush.msrb.mxu2 %v161_v13  ;;  %344 = vmatpush.msrb.mxu3 %v178_v14  ;;  %v152_v53 = vld [vmem:[#allocation6 + $0x318] sm:$0xff]  ;;  %v169_v54 = vld [vmem:[#allocation6 + $0x3a0] sm:$0xff]  ;;  %v187_v55 = vld.sshfl [vmem:[#allocation1 + $0x8] sm:$0xff pattern:$0x73625140] }
  0x34   :  { %286 = vmatpush.msrb.mxu0 %v128_v15  ;;  %305 = vmatpush.msrb.mxu1 %v145_v16  ;;  %v136_v57 = vld [vmem:[#allocation6 + $0x298] sm:$0xff]  ;;  %v118_v60 = vld [vmem:[#allocation6 + $0x208] sm:$0xff]  ;;  %v135_v61 = vld [vmem:[#allocation6 + $0x290] sm:$0xff]  ;;  %49 = vst [vmem:[#allocation2] sm:$0x3] %v481_v10 }
  0x35   :  { %326 = vmatpush.msrb.mxu2 %v160_v17  ;;  %345 = vmatpush.msrb.mxu3 %v177_v18  ;;  %v168_v59 = vld [vmem:[#allocation6 + $0x398] sm:$0xff]  ;;  %v150_v62 = vld [vmem:[#allocation6 + $0x308] sm:$0xff]  ;;  %v167_v63 = vld [vmem:[#allocation6 + $0x390] sm:$0xff] }
  0x36   :  { %287 = vmatpush.msrb.mxu0 %v127_v19  ;;  %306 = vmatpush.msrb.mxu1 %v144_v20  ;;  %v117_v0 = vld [vmem:[#allocation6 + $0x200] sm:$0xff]  ;;  %v134_v1 = vld [vmem:[#allocation6 + $0x288] sm:$0xff]  ;;  %v192_v5 = vld.sshfl [vmem:[#allocation1 + $0x30] sm:$0xff pattern:$0x73625140] }
  0x37   :  { %327 = vmatpush.msrb.mxu2 %v159_v21  ;;  %346 = vmatpush.msrb.mxu3 %v176_v22  ;;  %v149_v2 = vld [vmem:[#allocation6 + $0x300] sm:$0xff]  ;;  %v166_v3 = vld [vmem:[#allocation6 + $0x388] sm:$0xff] }
  0x38   :  { %288 = vmatpush.msrb.mxu0 %v126_v23  ;;  %307 = vmatpush.msrb.mxu1 %v143_v24  ;;  %v190_v4 = vld.sshfl [vmem:[#allocation1 + $0x20] sm:$0xff pattern:$0x73625140]  ;;  %v191_v8 = vld.sshfl [vmem:[#allocation1 + $0x28] sm:$0xff pattern:$0x73625140] }
  0x39   :  { %328 = vmatpush.msrb.mxu2 %v158_v25  ;;  %347 = vmatpush.msrb.mxu3 %v175_v26  ;;  %v133_v6 = vld [vmem:[#allocation6 + $0x280] sm:$0xff] }
  0x3a   :  { %289 = vmatpush.msrb.mxu0 %v125_v28  ;;  %308 = vmatpush.msrb.mxu1 %v142_v29  ;;  %v165_v7 = vld [vmem:[#allocation6 + $0x380] sm:$0xff] }
  0x3b   :  { %329 = vmatpush.msrb.mxu2 %v157_v30  ;;  %348 = vmatpush.msrb.mxu3 %v174_v31  ;;  %v193_v9 = vld.sshfl [vmem:[#allocation1 + $0x38] sm:$0xff pattern:$0x73625140]  ;;  %v52_v24 = vld [vmem:[#allocation2] sm:$0x3] }
  0x3c   :  { %290 = vmatpush.msrb.mxu0 %v124_v32  ;;  %309 = vmatpush.msrb.mxu1 %v141_v33  ;;  %v398_v28 = vld [vmem:[%s517_s2] ss:$0 sm:$0xff] }
  0x3d   :  { %330 = vmatpush.msrb.mxu2 %v156_v34  ;;  %349 = vmatpush.msrb.mxu3 %v173_v35 }
  0x3e   :  { %291 = vmatpush.msrb.mxu0 %v123_v36  ;;  %310 = vmatpush.msrb.mxu1 %v140_v37 }
  0x3f   :  { %331 = vmatpush.msrb.mxu2 %v155_v38  ;;  %350 = vmatpush.msrb.mxu3 %v172_v39 }
  0x40   :  { %292 = vmatpush.msrb.mxu0 %v122_v40  ;;  %311 = vmatpush.msrb.mxu1 %v139_v41 }
  0x41   :  { %332 = vmatpush.msrb.mxu2 %v154_v42  ;;  %351 = vmatpush.msrb.mxu3 %v171_v43 }
  0x42   :  { %258 = vmatmul.f32.vlgmr.msra.gmra.mxu2 %v188_v44  ;;  %293 = vmatpush.msrb.mxu0 %v121_v45 }
  0x43   :  { %312 = vmatpush.msrb.mxu1 %v138_v46  ;;  %333 = vmatpush.msrb.mxu2 %v153_v47 }
  0x44   :  { %352 = vmatpush.msrb.mxu3 %v170_v48  ;;  %218 = vmatmul.f32.vlgmr.msra.gmra.mxu0 %v186_v49 }
  0x45   :  { %278 = vmatmul.f32.vlgmr.msra.gmra.mxu3 %v189_v50  ;;  %294 = vmatpush.msrb.mxu0 %v120_v51 }
  0x46   :  { %313 = vmatpush.msrb.mxu1 %v137_v52  ;;  %334 = vmatpush.msrb.mxu2 %v152_v53 }
  0x47   :  { %353 = vmatpush.msrb.mxu3 %v169_v54  ;;  %238 = vmatmul.f32.vlgmr.msra.gmra.mxu1 %v187_v55 }
  0x48   :  { %295 = vmatpush.msrb.mxu0 %v119_v56  ;;  %314 = vmatpush.msrb.mxu1 %v136_v57 }
  0x49   :  { %335 = vmatpush.msrb.mxu2 %v151_v58  ;;  %354 = vmatpush.msrb.mxu3 %v168_v59 }
  0x4a   :  { %296 = vmatpush.msrb.mxu0 %v118_v60  ;;  %315 = vmatpush.msrb.mxu1 %v135_v61 }
  0x4b   :  { %336 = vmatpush.msrb.mxu2 %v150_v62  ;;  %355 = vmatpush.msrb.mxu3 %v167_v63 }
  0x4c   :  { %297 = vmatpush.msrb.mxu0 %v117_v0  ;;  %316 = vmatpush.msrb.mxu1 %v134_v1 }
  0x4d   :  { %337 = vmatpush.msrb.mxu2 %v149_v2  ;;  %356 = vmatpush.msrb.mxu3 %v166_v3 }
  0x4e   :  { %298 = vmatmul.f32.vlgmr.msrb.gmra.mxu0 %v190_v4  ;;  %338 = vmatmul.f32.vlgmr.msrb.gmra.mxu2 %v192_v5 }
  0x4f   :  { %317 = vmatpush.msrb.mxu1 %v133_v6  ;;  %357 = vmatpush.msrb.mxu3 %v165_v7 }
  0x50   :  { %318 = vmatmul.f32.vlgmr.msrb.gmra.mxu1 %v191_v8  ;;  %358 = vmatmul.f32.vlgmr.msrb.gmra.mxu3 %v193_v9 }
  0xc1   :  { %v219_v11 = vpop.f32.mrf.mxu0 }
  0xc4   :  { %v239_v12 = vpop.f32.mrf.mxu1 }
  0xc5   :  { %v240_v13 = vadd.f32 %v239_v12, %v219_v11  ;;  %v259_v14 = vpop.f32.mrf.mxu2 }
  0xc7   :  { %v260_v15 = vadd.f32 %v259_v14, %v240_v13 }
  0xc8   :  { %v279_v16 = vpop.f32.mrf.mxu3 }
  0xc9   :  { %v280_v17 = vadd.f32 %v279_v16, %v260_v15 }
  0xcb   :  { %v299_v18 = vpop.f32.mrf.mxu0 }
  0xcc   :  { %v300_v19 = vadd.f32 %v299_v18, %v280_v17 }
  0xcd   :  { %v319_v20 = vpop.f32.mrf.mxu1 }
  0xce   :  { %v320_v21 = vadd.f32 %v319_v20, %v300_v19 }
  0xd1   :  { %v339_v22 = vpop.f32.mrf.mxu2 }
  0xd2   :  { %v340_v23 = vadd.f32 %v339_v22, %v320_v21 }
  0xd3   :  { %v359_v25 = vpop.f32.mrf.mxu3 }
  0xd4   :  { %v360_v26 = vadd.f32 %v359_v25, %v340_v23 }
  0xd6   :  { %v362_v27 = vadd.f32 %v360_v26, %v52_v24 }
  0xd8   :  { %363 = vst [vmem:[#allocation2] sm:$0x3] %v362_v27 }
  0xdf   :  { %v367_v29 = vld [vmem:[#allocation2] sm:$0x3] }
  0xe0   :  { %v372_v30 = vadd.f32 %v398_v28, %v367_v29 }
  0xe2   :  { %373 = vst [vmem:[#allocation8] sm:$0x3] %v372_v30 }
  0xe3   :  { %384 = dma.vmem_to_hbm [thread:$0]  %s380_s25, 32, %s382_s28, [#allocation5]  }
  0xe4   :  { %475 = dma.done.wait [#allocation5], 32  }
  0xe5   :  { %476 = vsyncadd [#allocation5], 4294967264 }
  0xe6   :  { %389 = vsyncpa [#allocation4], 1 }
  0xe7   :  { %390 = vsyncpa [#allocation7], 1 }
  0xe8   :  { %391 = vsyncpa [#allocation5], 1 }

// kernel: tpu_custom_call.1
= control target key start
LH: loop header
LB: loop body
LE: loop exit
PB: predicated region body
PF: predicated region fallthrough
CT: control target
= control target key end

     0   :  { %8 = vsyncpa [#allocation4], 0  ;;  %s515_s0 = inlined_call_operand.hbm [shape: f32[2,1024], index: 0, kind: input, shape index: {}]   ;;  %s516_s1 = inlined_call_operand.hbm [shape: f32[1024,128], index: 1, kind: input, shape index: {}]   ;;  %s517_s2 = inlined_call_operand.vmem [shape: f32[1,128], index: 2, kind: input, shape index: {}]   ;;  %s518_s3 = inlined_call_operand.hbm [shape: f32[2,128], index: 3, kind: output, shape index: {}]  }
   0x1   :  { %9 = vsyncpa [#allocation7], 0 }
   0x2   :  { %10 = vsyncpa [#allocation5], 0  ;;  %s16_s14 = sshll.u32 %s515_s0, 4  ;;  %s477_s15 = smov [#allocation3]   ;;  %s17_s14 = int_to_ptr.hbm [resolvable:$true] %s16_s14 }
   0x3   :  { %s18_s16 = sshll.u32 %s477_s15, 4  ;;  %s26_s19 = sshll.u32 %s516_s1, 4  ;;  %s19_s16 = int_to_ptr.vmem [resolvable:$true] %s18_s16  ;;  %s27_s19 = int_to_ptr.hbm [resolvable:$true] %s26_s19 }
   0x4   :  { %21 = dma.hbm_to_vmem [thread:$0]  %s17_s14, 256, %s19_s16, [#allocation4]  }
   0x5   :  { %s478_s20 = smov [#allocation6]   ;;  %s479_s22 = smov 128  }
   0x6   :  { %s28_s21 = sshll.u32 %s478_s20, 4  ;;  %s480_s23 = smov 8   ;;  %s29_s21 = int_to_ptr.vmem [resolvable:$true] %s28_s21 }
   0x7   :  { %34 = dma.hbm_to_vmem [thread:$0]  %s27_s19, 16384, %s29_s21, [#allocation7], %s479_s22, %s479_s22, %s480_s23  }
   0x8   :  { %471 = dma.done.wait [#allocation4], 256  }
   0x9   :  { %472 = vsyncadd [#allocation4], 4294967040 }
   0xa   :  { %473 = dma.done.wait [#allocation7], 16384  }
   0xb   :  { %474 = vsyncadd [#allocation7], 4294950912  ;;  %v68_v0 = vld [vmem:[#allocation6 + $0x78] sm:$0xff]  ;;  %v67_v2 = vld [vmem:[#allocation6 + $0x70] sm:$0xff]  ;;  %s482_s24 = smov [#allocation8]   ;;  %s381_s28 = sshll.u32 %s518_s3, 4  ;;  %s382_s28 = int_to_ptr.hbm [resolvable:$true] %s381_s28 }
   0xc   :  { %v100_v1 = vld [vmem:[#allocation6 + $0x178] sm:$0xff]  ;;  %202 = vmatpush.msra.mxu0 %v68_v0  ;;  %v99_v4 = vld [vmem:[#allocation6 + $0x170] sm:$0xff]  ;;  %v66_v6 = vld [vmem:[#allocation6 + $0x68] sm:$0xff]  ;;  %s379_s25 = sshll.u32 %s482_s24, 4  ;;  %s380_s25 = int_to_ptr.vmem [resolvable:$true] %s379_s25 }
   0xd   :  { %242 = vmatpush.msra.mxu2 %v100_v1  ;;  %v84_v3 = vld [vmem:[#allocation6 + $0xf8] sm:$0xff]  ;;  %v83_v7 = vld [vmem:[#allocation6 + $0xf0] sm:$0xff]  ;;  %v98_v8 = vld [vmem:[#allocation6 + $0x168] sm:$0xff] }
   0xe   :  { %v116_v5 = vld [vmem:[#allocation6 + $0x1f8] sm:$0xff]  ;;  %222 = vmatpush.msra.mxu1 %v84_v3  ;;  %203 = vmatpush.msra.mxu0 %v67_v2  ;;  %v115_v9 = vld [vmem:[#allocation6 + $0x1f0] sm:$0xff]  ;;  %v82_v10 = vld [vmem:[#allocation6 + $0xe8] sm:$0xff] }
   0xf   :  { %262 = vmatpush.msra.mxu3 %v116_v5  ;;  %243 = vmatpush.msra.mxu2 %v99_v4  ;;  %v65_v11 = vld [vmem:[#allocation6 + $0x60] sm:$0xff]  ;;  %v114_v13 = vld [vmem:[#allocation6 + $0x1e8] sm:$0xff]  ;;  %v64_v16 = vld [vmem:[#allocation6 + $0x58] sm:$0xff] }
  0x10   :  { %223 = vmatpush.msra.mxu1 %v83_v7  ;;  %v97_v12 = vld [vmem:[#allocation6 + $0x160] sm:$0xff]  ;;  %204 = vmatpush.msra.mxu0 %v66_v6  ;;  %v96_v17 = vld [vmem:[#allocation6 + $0x158] sm:$0xff]  ;;  %v63_v20 = vld [vmem:[#allocation6 + $0x50] sm:$0xff] }
  0x11   :  { %263 = vmatpush.msra.mxu3 %v115_v9  ;;  %244 = vmatpush.msra.mxu2 %v98_v8  ;;  %v81_v14 = vld [vmem:[#allocation6 + $0xe0] sm:$0xff]  ;;  %v80_v18 = vld [vmem:[#allocation6 + $0xd8] sm:$0xff]  ;;  %v95_v21 = vld [vmem:[#allocation6 + $0x150] sm:$0xff] }
  0x12   :  { %v113_v15 = vld [vmem:[#allocation6 + $0x1e0] sm:$0xff]  ;;  %224 = vmatpush.msra.mxu1 %v82_v10  ;;  %205 = vmatpush.msra.mxu0 %v65_v11  ;;  %v112_v19 = vld [vmem:[#allocation6 + $0x1d8] sm:$0xff]  ;;  %v79_v22 = vld [vmem:[#allocation6 + $0xd0] sm:$0xff] }
  0x13   :  { %264 = vmatpush.msra.mxu3 %v114_v13  ;;  %245 = vmatpush.msra.mxu2 %v97_v12  ;;  %v111_v23 = vld [vmem:[#allocation6 + $0x1d0] sm:$0xff]  ;;  %v62_v24 = vld [vmem:[#allocation6 + $0x48] sm:$0xff]  ;;  %v61_v28 = vld [vmem:[#allocation6 + $0x40] sm:$0xff] }
  0x14   :  { %225 = vmatpush.msra.mxu1 %v81_v14  ;;  %206 = vmatpush.msra.mxu0 %v64_v16  ;;  %v94_v25 = vld [vmem:[#allocation6 + $0x148] sm:$0xff]  ;;  %v93_v29 = vld [vmem:[#allocation6 + $0x140] sm:$0xff]  ;;  %v60_v32 = vld [vmem:[#allocation6 + $0x38] sm:$0xff] }
  0x15   :  { %265 = vmatpush.msra.mxu3 %v113_v15  ;;  %246 = vmatpush.msra.mxu2 %v96_v17  ;;  %v78_v26 = vld [vmem:[#allocation6 + $0xc8] sm:$0xff]  ;;  %v77_v30 = vld [vmem:[#allocation6 + $0xc0] sm:$0xff]  ;;  %v92_v33 = vld [vmem:[#allocation6 + $0x138] sm:$0xff] }
  0x16   :  { %226 = vmatpush.msra.mxu1 %v80_v18  ;;  %207 = vmatpush.msra.mxu0 %v63_v20  ;;  %v110_v27 = vld [vmem:[#allocation6 + $0x1c8] sm:$0xff]  ;;  %v109_v31 = vld [vmem:[#allocation6 + $0x1c0] sm:$0xff]  ;;  %v76_v34 = vld [vmem:[#allocation6 + $0xb8] sm:$0xff] }
  0x17   :  { %266 = vmatpush.msra.mxu3 %v112_v19  ;;  %247 = vmatpush.msra.mxu2 %v95_v21  ;;  %v108_v35 = vld [vmem:[#allocation6 + $0x1b8] sm:$0xff]  ;;  %v59_v36 = vld [vmem:[#allocation6 + $0x30] sm:$0xff]  ;;  %v58_v40 = vld [vmem:[#allocation6 + $0x28] sm:$0xff] }
  0x18   :  { %227 = vmatpush.msra.mxu1 %v79_v22  ;;  %208 = vmatpush.msra.mxu0 %v62_v24  ;;  %v91_v37 = vld [vmem:[#allocation6 + $0x130] sm:$0xff]  ;;  %v90_v41 = vld [vmem:[#allocation6 + $0x128] sm:$0xff]  ;;  %v57_v44 = vld [vmem:[#allocation6 + $0x20] sm:$0xff] }
  0x19   :  { %267 = vmatpush.msra.mxu3 %v111_v23  ;;  %248 = vmatpush.msra.mxu2 %v94_v25  ;;  %v75_v38 = vld [vmem:[#allocation6 + $0xb0] sm:$0xff]  ;;  %v74_v42 = vld [vmem:[#allocation6 + $0xa8] sm:$0xff]  ;;  %v89_v45 = vld [vmem:[#allocation6 + $0x120] sm:$0xff] }
  0x1a   :  { %228 = vmatpush.msra.mxu1 %v78_v26  ;;  %209 = vmatpush.msra.mxu0 %v61_v28  ;;  %v107_v39 = vld [vmem:[#allocation6 + $0x1b0] sm:$0xff]  ;;  %v106_v43 = vld [vmem:[#allocation6 + $0x1a8] sm:$0xff]  ;;  %v73_v46 = vld [vmem:[#allocation6 + $0xa0] sm:$0xff] }
  0x1b   :  { %268 = vmatpush.msra.mxu3 %v110_v27  ;;  %249 = vmatpush.msra.mxu2 %v93_v29  ;;  %v105_v47 = vld [vmem:[#allocation6 + $0x1a0] sm:$0xff]  ;;  %v56_v48 = vld [vmem:[#allocation6 + $0x18] sm:$0xff]  ;;  %v55_v52 = vld [vmem:[#allocation6 + $0x10] sm:$0xff] }
  0x1c   :  { %229 = vmatpush.msra.mxu1 %v77_v30  ;;  %210 = vmatpush.msra.mxu0 %v60_v32  ;;  %v88_v49 = vld [vmem:[#allocation6 + $0x118] sm:$0xff]  ;;  %v87_v53 = vld [vmem:[#allocation6 + $0x110] sm:$0xff]  ;;  %v54_v56 = vld [vmem:[#allocation6 + $0x8] sm:$0xff] }
  0x1d   :  { %269 = vmatpush.msra.mxu3 %v109_v31  ;;  %250 = vmatpush.msra.mxu2 %v92_v33  ;;  %v72_v50 = vld [vmem:[#allocation6 + $0x98] sm:$0xff]  ;;  %v71_v54 = vld [vmem:[#allocation6 + $0x90] sm:$0xff]  ;;  %v86_v57 = vld [vmem:[#allocation6 + $0x108] sm:$0xff] }
  0x1e   :  { %230 = vmatpush.msra.mxu1 %v76_v34  ;;  %211 = vmatpush.msra.mxu0 %v59_v36  ;;  %v104_v51 = vld [vmem:[#allocation6 + $0x198] sm:$0xff]  ;;  %v103_v55 = vld [vmem:[#allocation6 + $0x190] sm:$0xff]  ;;  %v70_v58 = vld [vmem:[#allocation6 + $0x88] sm:$0xff] }
  0x1f   :  { %270 = vmatpush.msra.mxu3 %v108_v35  ;;  %251 = vmatpush.msra.mxu2 %v91_v37  ;;  %v102_v59 = vld [vmem:[#allocation6 + $0x188] sm:$0xff]  ;;  %v53_v60 = vld [vmem:[#allocation6] sm:$0xff]  ;;  %v132_v62 = vld [vmem:[#allocation6 + $0x278] sm:$0xff] }
  0x20   :  { %231 = vmatpush.msra.mxu1 %v75_v38  ;;  %212 = vmatpush.msra.mxu0 %v58_v40  ;;  %v85_v61 = vld [vmem:[#allocation6 + $0x100] sm:$0xff]  ;;  %v164_v63 = vld [vmem:[#allocation6 + $0x378] sm:$0xff]  ;;  %v131_v2 = vld [vmem:[#allocation6 + $0x270] sm:$0xff] }
  0x21   :  { %271 = vmatpush.msra.mxu3 %v107_v39  ;;  %252 = vmatpush.msra.mxu2 %v90_v41  ;;  %v69_v0 = vld [vmem:[#allocation6 + $0x80] sm:$0xff]  ;;  %v148_v3 = vld [vmem:[#allocation6 + $0x2f8] sm:$0xff]  ;;  %v163_v4 = vld [vmem:[#allocation6 + $0x370] sm:$0xff] }
  0x22   :  { %232 = vmatpush.msra.mxu1 %v74_v42  ;;  %213 = vmatpush.msra.mxu0 %v57_v44  ;;  %v101_v1 = vld [vmem:[#allocation6 + $0x180] sm:$0xff]  ;;  %v180_v5 = vld [vmem:[#allocation6 + $0x3f8] sm:$0xff]  ;;  %v130_v6 = vld [vmem:[#allocation6 + $0x268] sm:$0xff] }
  0x23   :  { %272 = vmatpush.msra.mxu3 %v106_v43  ;;  %253 = vmatpush.msra.mxu2 %v89_v45  ;;  %v147_v7 = vld [vmem:[#allocation6 + $0x2f0] sm:$0xff]  ;;  %v162_v8 = vld [vmem:[#allocation6 + $0x368] sm:$0xff]  ;;  %v129_v10 = vld [vmem:[#allocation6 + $0x260] sm:$0xff] }
  0x24   :  { %233 = vmatpush.msra.mxu1 %v73_v46  ;;  %214 = vmatpush.msra.mxu0 %v56_v48  ;;  %v179_v9 = vld [vmem:[#allocation6 + $0x3f0] sm:$0xff]  ;;  %v146_v11 = vld [vmem:[#allocation6 + $0x2e8] sm:$0xff]  ;;  %v161_v13 = vld [vmem:[#allocation6 + $0x360] sm:$0xff] }
  0x25   :  { %273 = vmatpush.msra.mxu3 %v105_v47  ;;  %254 = vmatpush.msra.mxu2 %v88_v49  ;;  %v50_v12 = vld [vmem:[#allocation3] sm:$0xff]  ;;  %v178_v14 = vld [vmem:[#allocation6 + $0x3e8] sm:$0xff]  ;;  %v128_v15 = vld [vmem:[#allocation6 + $0x258] sm:$0xff] }
  0x26   :  { %234 = vmatpush.msra.mxu1 %v72_v50  ;;  %215 = vmatpush.msra.mxu0 %v55_v52  ;;  %183 = vst [vmem:[#allocation1] ss:$4 sm:$0xff] %v50_v12  ;;  %v145_v16 = vld [vmem:[#allocation6 + $0x2e0] sm:$0xff]  ;;  %v160_v17 = vld [vmem:[#allocation6 + $0x358] sm:$0xff]  ;;  %v127_v19 = vld [vmem:[#allocation6 + $0x250] sm:$0xff] }
  0x27   :  { %274 = vmatpush.msra.mxu3 %v104_v51  ;;  %255 = vmatpush.msra.mxu2 %v87_v53  ;;  %v177_v18 = vld [vmem:[#allocation6 + $0x3e0] sm:$0xff]  ;;  %v144_v20 = vld [vmem:[#allocation6 + $0x2d8] sm:$0xff]  ;;  %v159_v21 = vld [vmem:[#allocation6 + $0x350] sm:$0xff] }
  0x28   :  { %235 = vmatpush.msra.mxu1 %v71_v54  ;;  %216 = vmatpush.msra.mxu0 %v54_v56  ;;  %v176_v22 = vld [vmem:[#allocation6 + $0x3d8] sm:$0xff]  ;;  %v126_v23 = vld [vmem:[#allocation6 + $0x248] sm:$0xff]  ;;  %v143_v24 = vld [vmem:[#allocation6 + $0x2d0] sm:$0xff] }
  0x29   :  { %275 = vmatpush.msra.mxu3 %v103_v55  ;;  %256 = vmatpush.msra.mxu2 %v86_v57  ;;  %v158_v25 = vld [vmem:[#allocation6 + $0x348] sm:$0xff]  ;;  %v175_v26 = vld [vmem:[#allocation6 + $0x3d0] sm:$0xff]  ;;  %v51_v27 = vld [vmem:[#allocation3 + $0x8] sm:$0xff] }
  0x2a   :  { %236 = vmatpush.msra.mxu1 %v70_v58  ;;  %217 = vmatpush.msra.mxu0 %v53_v60  ;;  %v125_v28 = vld [vmem:[#allocation6 + $0x240] sm:$0xff]  ;;  %v142_v29 = vld [vmem:[#allocation6 + $0x2c8] sm:$0xff]  ;;  %v124_v32 = vld [vmem:[#allocation6 + $0x238] sm:$0xff]  ;;  %185 = vst [vmem:[#allocation1 + $0x20] ss:$4 sm:$0xff] %v51_v27 }
  0x2b   :  { %276 = vmatpush.msra.mxu3 %v102_v59  ;;  %257 = vmatpush.msra.mxu2 %v85_v61  ;;  %v157_v30 = vld [vmem:[#allocation6 + $0x340] sm:$0xff]  ;;  %v174_v31 = vld [vmem:[#allocation6 + $0x3c8] sm:$0xff]  ;;  %v156_v34 = vld [vmem:[#allocation6 + $0x338] sm:$0xff] }
  0x2c   :  { %282 = vmatpush.msrb.mxu0 %v132_v62  ;;  %237 = vmatpush.msra.mxu1 %v69_v0  ;;  %v141_v33 = vld [vmem:[#allocation6 + $0x2c0] sm:$0xff]  ;;  %v123_v36 = vld [vmem:[#allocation6 + $0x230] sm:$0xff]  ;;  %v140_v37 = vld [vmem:[#allocation6 + $0x2b8] sm:$0xff] }
  0x2d   :  { %322 = vmatpush.msrb.mxu2 %v164_v63  ;;  %277 = vmatpush.msra.mxu3 %v101_v1  ;;  %v173_v35 = vld [vmem:[#allocation6 + $0x3c0] sm:$0xff]  ;;  %v155_v38 = vld [vmem:[#allocation6 + $0x330] sm:$0xff]  ;;  %v172_v39 = vld [vmem:[#allocation6 + $0x3b8] sm:$0xff] }
  0x2e   :  { %283 = vmatpush.msrb.mxu0 %v131_v2  ;;  %302 = vmatpush.msrb.mxu1 %v148_v3  ;;  %v122_v40 = vld [vmem:[#allocation6 + $0x228] sm:$0xff]  ;;  %v139_v41 = vld [vmem:[#allocation6 + $0x2b0] sm:$0xff]  ;;  %v121_v45 = vld [vmem:[#allocation6 + $0x220] sm:$0xff] }
  0x2f   :  { %323 = vmatpush.msrb.mxu2 %v163_v4  ;;  %342 = vmatpush.msrb.mxu3 %v180_v5  ;;  %v154_v42 = vld [vmem:[#allocation6 + $0x328] sm:$0xff]  ;;  %v171_v43 = vld [vmem:[#allocation6 + $0x3b0] sm:$0xff]  ;;  %v153_v47 = vld [vmem:[#allocation6 + $0x320] sm:$0xff] }
  0x30   :  { %284 = vmatpush.msrb.mxu0 %v130_v6  ;;  %303 = vmatpush.msrb.mxu1 %v147_v7  ;;  %v188_v44 = vld.sshfl [vmem:[#allocation1 + $0x10] sm:$0xff pattern:$0x73625140]  ;;  %v138_v46 = vld [vmem:[#allocation6 + $0x2a8] sm:$0xff]  ;;  %v137_v52 = vld [vmem:[#allocation6 + $0x2a0] sm:$0xff] }
  0x31   :  { %324 = vmatpush.msrb.mxu2 %v162_v8  ;;  %343 = vmatpush.msrb.mxu3 %v179_v9  ;;  %v170_v48 = vld [vmem:[#allocation6 + $0x3a8] sm:$0xff]  ;;  %v189_v50 = vld.sshfl [vmem:[#allocation1 + $0x18] sm:$0xff pattern:$0x73625140]  ;;  %v119_v56 = vld [vmem:[#allocation6 + $0x210] sm:$0xff] }
  0x32   :  { %285 = vmatpush.msrb.mxu0 %v129_v10  ;;  %304 = vmatpush.msrb.mxu1 %v146_v11  ;;  %v186_v49 = vld.sshfl [vmem:[#allocation1] sm:$0xff pattern:$0x73625140]  ;;  %v120_v51 = vld [vmem:[#allocation6 + $0x218] sm:$0xff]  ;;  %v151_v58 = vld [vmem:[#allocation6 + $0x310] sm:$0xff]  ;;  %v481_v10 = vmov 0.0  }
  0x33   :  { %325 = vmatpush.msrb.mxu2 %v161_v13  ;;  %344 = vmatpush.msrb.mxu3 %v178_v14  ;;  %v152_v53 = vld [vmem:[#allocation6 + $0x318] sm:$0xff]  ;;  %v169_v54 = vld [vmem:[#allocation6 + $0x3a0] sm:$0xff]  ;;  %v187_v55 = vld.sshfl [vmem:[#allocation1 + $0x8] sm:$0xff pattern:$0x73625140] }
  0x34   :  { %286 = vmatpush.msrb.mxu0 %v128_v15  ;;  %305 = vmatpush.msrb.mxu1 %v145_v16  ;;  %v136_v57 = vld [vmem:[#allocation6 + $0x298] sm:$0xff]  ;;  %v118_v60 = vld [vmem:[#allocation6 + $0x208] sm:$0xff]  ;;  %v135_v61 = vld [vmem:[#allocation6 + $0x290] sm:$0xff]  ;;  %49 = vst [vmem:[#allocation2] sm:$0x3] %v481_v10 }
  0x35   :  { %326 = vmatpush.msrb.mxu2 %v160_v17  ;;  %345 = vmatpush.msrb.mxu3 %v177_v18  ;;  %v168_v59 = vld [vmem:[#allocation6 + $0x398] sm:$0xff]  ;;  %v150_v62 = vld [vmem:[#allocation6 + $0x308] sm:$0xff]  ;;  %v167_v63 = vld [vmem:[#allocation6 + $0x390] sm:$0xff] }
  0x36   :  { %287 = vmatpush.msrb.mxu0 %v127_v19  ;;  %306 = vmatpush.msrb.mxu1 %v144_v20  ;;  %v117_v0 = vld [vmem:[#allocation6 + $0x200] sm:$0xff]  ;;  %v134_v1 = vld [vmem:[#allocation6 + $0x288] sm:$0xff]  ;;  %v192_v5 = vld.sshfl [vmem:[#allocation1 + $0x30] sm:$0xff pattern:$0x73625140] }
  0x37   :  { %327 = vmatpush.msrb.mxu2 %v159_v21  ;;  %346 = vmatpush.msrb.mxu3 %v176_v22  ;;  %v149_v2 = vld [vmem:[#allocation6 + $0x300] sm:$0xff]  ;;  %v166_v3 = vld [vmem:[#allocation6 + $0x388] sm:$0xff] }
  0x38   :  { %288 = vmatpush.msrb.mxu0 %v126_v23  ;;  %307 = vmatpush.msrb.mxu1 %v143_v24  ;;  %v190_v4 = vld.sshfl [vmem:[#allocation1 + $0x20] sm:$0xff pattern:$0x73625140]  ;;  %v191_v8 = vld.sshfl [vmem:[#allocation1 + $0x28] sm:$0xff pattern:$0x73625140] }
  0x39   :  { %328 = vmatpush.msrb.mxu2 %v158_v25  ;;  %347 = vmatpush.msrb.mxu3 %v175_v26  ;;  %v133_v6 = vld [vmem:[#allocation6 + $0x280] sm:$0xff] }
  0x3a   :  { %289 = vmatpush.msrb.mxu0 %v125_v28  ;;  %308 = vmatpush.msrb.mxu1 %v142_v29  ;;  %v165_v7 = vld [vmem:[#allocation6 + $0x380] sm:$0xff] }
  0x3b   :  { %329 = vmatpush.msrb.mxu2 %v157_v30  ;;  %348 = vmatpush.msrb.mxu3 %v174_v31  ;;  %v193_v9 = vld.sshfl [vmem:[#allocation1 + $0x38] sm:$0xff pattern:$0x73625140]  ;;  %v52_v24 = vld [vmem:[#allocation2] sm:$0x3] }
  0x3c   :  { %290 = vmatpush.msrb.mxu0 %v124_v32  ;;  %309 = vmatpush.msrb.mxu1 %v141_v33  ;;  %v398_v28 = vld [vmem:[%s517_s2] ss:$0 sm:$0xff] }
  0x3d   :  { %330 = vmatpush.msrb.mxu2 %v156_v34  ;;  %349 = vmatpush.msrb.mxu3 %v173_v35 }
  0x3e   :  { %291 = vmatpush.msrb.mxu0 %v123_v36  ;;  %310 = vmatpush.msrb.mxu1 %v140_v37 }
  0x3f   :  { %331 = vmatpush.msrb.mxu2 %v155_v38  ;;  %350 = vmatpush.msrb.mxu3 %v172_v39 }
  0x40   :  { %292 = vmatpush.msrb.mxu0 %v122_v40  ;;  %311 = vmatpush.msrb.mxu1 %v139_v41 }
  0x41   :  { %332 = vmatpush.msrb.mxu2 %v154_v42  ;;  %351 = vmatpush.msrb.mxu3 %v171_v43 }
  0x42   :  { %258 = vmatmul.f32.vlgmr.msra.gmra.mxu2 %v188_v44  ;;  %293 = vmatpush.msrb.mxu0 %v121_v45 }
  0x43   :  { %312 = vmatpush.msrb.mxu1 %v138_v46  ;;  %333 = vmatpush.msrb.mxu2 %v153_v47 }
  0x44   :  { %352 = vmatpush.msrb.mxu3 %v170_v48  ;;  %218 = vmatmul.f32.vlgmr.msra.gmra.mxu0 %v186_v49 }
  0x45   :  { %278 = vmatmul.f32.vlgmr.msra.gmra.mxu3 %v189_v50  ;;  %294 = vmatpush.msrb.mxu0 %v120_v51 }
  0x46   :  { %313 = vmatpush.msrb.mxu1 %v137_v52  ;;  %334 = vmatpush.msrb.mxu2 %v152_v53 }
  0x47   :  { %353 = vmatpush.msrb.mxu3 %v169_v54  ;;  %238 = vmatmul.f32.vlgmr.msra.gmra.mxu1 %v187_v55 }
  0x48   :  { %295 = vmatpush.msrb.mxu0 %v119_v56  ;;  %314 = vmatpush.msrb.mxu1 %v136_v57 }
  0x49   :  { %335 = vmatpush.msrb.mxu2 %v151_v58  ;;  %354 = vmatpush.msrb.mxu3 %v168_v59 }
  0x4a   :  { %296 = vmatpush.msrb.mxu0 %v118_v60  ;;  %315 = vmatpush.msrb.mxu1 %v135_v61 }
  0x4b   :  { %336 = vmatpush.msrb.mxu2 %v150_v62  ;;  %355 = vmatpush.msrb.mxu3 %v167_v63 }
  0x4c   :  { %297 = vmatpush.msrb.mxu0 %v117_v0  ;;  %316 = vmatpush.msrb.mxu1 %v134_v1 }
  0x4d   :  { %337 = vmatpush.msrb.mxu2 %v149_v2  ;;  %356 = vmatpush.msrb.mxu3 %v166_v3 }
  0x4e   :  { %298 = vmatmul.f32.vlgmr.msrb.gmra.mxu0 %v190_v4  ;;  %338 = vmatmul.f32.vlgmr.msrb.gmra.mxu2 %v192_v5 }
  0x4f   :  { %317 = vmatpush.msrb.mxu1 %v133_v6  ;;  %357 = vmatpush.msrb.mxu3 %v165_v7 }
  0x50   :  { %318 = vmatmul.f32.vlgmr.msrb.gmra.mxu1 %v191_v8  ;;  %358 = vmatmul.f32.vlgmr.msrb.gmra.mxu3 %v193_v9 }
  0xc1   :  { %v219_v11 = vpop.f32.mrf.mxu0 }
  0xc4   :  { %v239_v12 = vpop.f32.mrf.mxu1 }
  0xc5   :  { %v240_v13 = vadd.f32 %v239_v12, %v219_v11  ;;  %v259_v14 = vpop.f32.mrf.mxu2 }
  0xc7   :  { %v260_v15 = vadd.f32 %v259_v14, %v240_v13 }
  0xc8   :  { %v279_v16 = vpop.f32.mrf.mxu3 }
  0xc9   :  { %v280_v17 = vadd.f32 %v279_v16, %v260_v15 }
  0xcb   :  { %v299_v18 = vpop.f32.mrf.mxu0 }
  0xcc   :  { %v300_v19 = vadd.f32 %v299_v18, %v280_v17 }
  0xcd   :  { %v319_v20 = vpop.f32.mrf.mxu1 }
  0xce   :  { %v320_v21 = vadd.f32 %v319_v20, %v300_v19 }
  0xd1   :  { %v339_v22 = vpop.f32.mrf.mxu2 }
  0xd2   :  { %v340_v23 = vadd.f32 %v339_v22, %v320_v21 }
  0xd3   :  { %v359_v25 = vpop.f32.mrf.mxu3 }
  0xd4   :  { %v360_v26 = vadd.f32 %v359_v25, %v340_v23 }
  0xd6   :  { %v362_v27 = vadd.f32 %v360_v26, %v52_v24 }
  0xd8   :  { %363 = vst [vmem:[#allocation2] sm:$0x3] %v362_v27 }
  0xdf   :  { %v367_v29 = vld [vmem:[#allocation2] sm:$0x3] }
  0xe0   :  { %v372_v30 = vadd.f32 %v398_v28, %v367_v29 }
  0xe2   :  { %373 = vst [vmem:[#allocation8] sm:$0x3] %v372_v30 }
  0xe3   :  { %384 = dma.vmem_to_hbm [thread:$0]  %s380_s25, 32, %s382_s28, [#allocation5]  }
  0xe4   :  { %475 = dma.done.wait [#allocation5], 32  }
  0xe5   :  { %476 = vsyncadd [#allocation5], 4294967264 }
  0xe6   :  { %389 = vsyncpa [#allocation4], 1 }
  0xe7   :  { %390 = vsyncpa [#allocation7], 1 }
  0xe8   :  { %391 = vsyncpa [#allocation5], 1 }

</bundles_post_ra>
